<compile_context>
chip_gen: v7x
topology: tpu7x:2x2x1
jax: 0.10.0
libtpu: 0.0.40
codegen_flags: <defaults>
</compile_context>

<pallas_src>
import functools
import math

import jax
import jax.numpy as jnp
from jax.experimental import pallas as pl
from jax.experimental.pallas import tpu as pltpu

EPS = 1e-6  # RMSNorm eps


# ---------------------------------------------------------------------------
# VMEM budget / tile selection helpers
# ---------------------------------------------------------------------------
def _vmem_budget_bytes():
    """Per-generation scoped-VMEM budget: physical capacity minus 16 MiB headroom."""
    cap = 64 * 1024 * 1024  # conservative default (v7x physical VMEM per TC)
    try:
        info = pltpu.get_tpu_info()
        cap = int(getattr(info, "vmem_capacity_bytes", cap)) or cap
    except Exception:
        pass
    return max(cap - 16 * 1024 * 1024, 32 * 1024 * 1024)


def _pick_tile(n, prefs, cap=None):
    """Largest preferred tile that divides n (and fits cap); fall back to n."""
    for t in prefs:
        if t <= n and n % t == 0 and (cap is None or t <= cap):
            return t
    return n


def _choose_tf(D, F, budget):
    """Full-F weight residency if the fused bf16 weights fit; else a 128-multiple."""
    for tf in (F, 2048, 1024, 512, 256, 128):
        if tf > F or F % tf:
            continue
        w_bytes = 2 * (D * 2 * tf + tf * D) * 2          # w13 + w2, bf16, double-buffered
        act_min = 8 * (8 * D + 2 * D + 4 * D)            # tm=8 activations
        if w_bytes + act_min <= budget:
            return tf
    return 128 if F % 128 == 0 else F


def _choose_tm(rows_p, D, tf, F, budget):
    """Largest MXU-friendly row tile that keeps the FFN kernel within budget."""
    w_bytes = 2 * (D * 2 * tf + tf * D) * 2
    extra = (D * 4 + D * 2) if tf < F else 0             # f32 acc + bf16 xn scratch / row
    for tm in (1024, 512, 256, 128, 64, 32, 16, 8):
        if tm > rows_p or rows_p % tm:
            continue
        act = tm * (2 * D * 4 + 2 * D * 4) + tm * extra  # x + out tiles, double-buffered
        if w_bytes + act <= budget:
            return tm
    return 8


def _fuse_w13(w1t, w3t, tf):
    """(D, F)+(D, F) -> (D, 2F) with per-F-tile [w1_tile | w3_tile] layout."""
    D, F = w1t.shape
    nf = F // tf
    w1r = w1t.reshape(D, nf, tf)
    w3r = w3t.reshape(D, nf, tf)
    return jnp.concatenate([w1r, w3r], axis=-1).reshape(D, 2 * F)


def prepare_params(params, *, d_model, nhead, dim_feedforward):
    """One-time (build-time) weight fusion / cast / scale-folding."""
    D = d_model
    hd = D // nhead
    budget = _vmem_budget_bytes()
    tf = _choose_tf(D, dim_feedforward, budget)
    return {
        "tf": tf,
        "norm1_w": params["norm1_w"].reshape(1, D).astype(jnp.float32),
        "norm2_w": params["norm2_w"].reshape(1, D).astype(jnp.float32),
        "w13": _fuse_w13(params["w1_t"], params["w3_t"], tf).astype(jnp.bfloat16),
        "w2": params["w2_t"].astype(jnp.bfloat16),
        # fold the 1/sqrt(head_dim) attention scale into Wq (free at runtime)
        "wq": (params["wq_t"] * (1.0 / math.sqrt(hd))).astype(jnp.bfloat16),
        "wdkv": params["wdkv_t"].astype(jnp.bfloat16),
        "wuk": params["wuk_t"].astype(jnp.bfloat16),
        "wuv": params["wuv_t"].astype(jnp.bfloat16),
        "wo": params["wo_t"].astype(jnp.bfloat16),
    }


# ---------------------------------------------------------------------------
# Kernel 1: fused RMSNorm + SwiGLU FFN + residual
# ---------------------------------------------------------------------------
def _ffn_kernel_fullf(x_ref, g_ref, w13_ref, w2_ref, o_ref):
    """Full-F weight residency: single pass, no accumulator."""
    tf = w13_ref.shape[1] // 2
    x = x_ref[...].astype(jnp.float32)
    ms = jnp.mean(x * x, axis=-1, keepdims=True)
    xn = (x * jax.lax.rsqrt(ms + EPS) * g_ref[...]).astype(jnp.bfloat16)   # RMSNorm (norm1)
    h = jnp.dot(xn, w13_ref[...], preferred_element_type=jnp.float32)      # [gate | value]
    gate = h[:, :tf]
    gate = gate * jax.nn.sigmoid(gate)                                      # SiLU
    hidden = (gate * h[:, tf:]).astype(w2_ref.dtype)
    y = jnp.dot(hidden, w2_ref[...], preferred_element_type=jnp.float32)
    o_ref[...] = (x + y).astype(o_ref.dtype)                                # residual


def _ffn_kernel_tiledf(x_ref, g_ref, w13_ref, w2_ref, o_ref, xn_ref, acc_ref):
    """F tiled as an 'arbitrary' reduction axis with an f32 VMEM accumulator."""
    tf = w13_ref.shape[1] // 2
    f = pl.program_id(1)

    @pl.when(f == 0)
    def _():
        x = x_ref[...].astype(jnp.float32)
        ms = jnp.mean(x * x, axis=-1, keepdims=True)
        xn_ref[...] = (x * jax.lax.rsqrt(ms + EPS) * g_ref[...]).astype(xn_ref.dtype)
        acc_ref[...] = jnp.zeros_like(acc_ref)

    h = jnp.dot(xn_ref[...], w13_ref[...], preferred_element_type=jnp.float32)
    gate = h[:, :tf]
    gate = gate * jax.nn.sigmoid(gate)
    hidden = (gate * h[:, tf:]).astype(w2_ref.dtype)
    acc_ref[...] += jnp.dot(hidden, w2_ref[...], preferred_element_type=jnp.float32)

    @pl.when(f == pl.num_programs(1) - 1)
    def _():
        o_ref[...] = (x_ref[...].astype(jnp.float32) + acc_ref[...]).astype(o_ref.dtype)


def ffn_block(x, prep):
    B, S, D = x.shape
    F = prep["w2"].shape[0]
    tf = prep["tf"]
    budget = _vmem_budget_bytes()

    rows = B * S
    rows_p = pl.cdiv(rows, 8) * 8
    tm = _choose_tm(rows_p, D, tf, F, budget)

    x2 = x.reshape(rows, D)
    if rows_p != rows:
        x2 = jnp.pad(x2, ((0, rows_p - rows), (0, 0)))

    if tf == F:
        out = pl.pallas_call(
            _ffn_kernel_fullf,
            out_shape=jax.ShapeDtypeStruct((rows_p, D), x.dtype),
            grid_spec=pltpu.PrefetchScalarGridSpec(
                num_scalar_prefetch=0,
                grid=(rows_p // tm,),
                in_specs=[
                    pl.BlockSpec((tm, D), lambda i: (i, 0)),
                    pl.BlockSpec((1, D), lambda i: (0, 0)),
                    pl.BlockSpec((D, 2 * F), lambda i: (0, 0)),
                    pl.BlockSpec((F, D), lambda i: (0, 0)),
                ],
                out_specs=pl.BlockSpec((tm, D), lambda i: (i, 0)),
            ),
            input_output_aliases={0: 0},
            compiler_params=pltpu.CompilerParams(
                dimension_semantics=("parallel",),
                vmem_limit_bytes=budget),
        )(x2, prep["norm1_w"], prep["w13"], prep["w2"])
    else:
        nf = F // tf
        out = pl.pallas_call(
            _ffn_kernel_tiledf,
            out_shape=jax.ShapeDtypeStruct((rows_p, D), x.dtype),
            grid_spec=pltpu.PrefetchScalarGridSpec(
                num_scalar_prefetch=0,
                grid=(rows_p // tm, nf),
                in_specs=[
                    pl.BlockSpec((tm, D), lambda i, f: (i, 0)),
                    pl.BlockSpec((1, D), lambda i, f: (0, 0)),
                    pl.BlockSpec((D, 2 * tf), lambda i, f: (0, f)),
                    pl.BlockSpec((tf, D), lambda i, f: (f, 0)),
                ],
                out_specs=pl.BlockSpec((tm, D), lambda i, f: (i, 0)),
                scratch_shapes=[
                    pltpu.VMEM((tm, D), jnp.bfloat16),   # cached normed activations
                    pltpu.VMEM((tm, D), jnp.float32),    # f32 accumulator over F tiles
                ],
            ),
            input_output_aliases={0: 0},
            compiler_params=pltpu.CompilerParams(
                dimension_semantics=("parallel", "arbitrary"),
                vmem_limit_bytes=budget),
        )(x2, prep["norm1_w"], prep["w13"], prep["w2"])

    return out[:rows].reshape(B, S, D)


# ---------------------------------------------------------------------------
# Kernel 2a: RMSNorm + Q/K/V projections in head-batched (B, H, S, hd) layout
# ---------------------------------------------------------------------------
def _mla_qkv_kernel(x_ref, g_ref, wq_ref, wdkv_ref, wuk_ref, wuv_ref,
                    q_ref, k_ref, v_ref, *, nhead):
    tr, D = x_ref.shape
    hd = D // nhead
    x = x_ref[...].astype(jnp.float32)
    ms = jnp.mean(x * x, axis=-1, keepdims=True)
    xn = (x * jax.lax.rsqrt(ms + EPS) * g_ref[...]).astype(jnp.bfloat16)   # RMSNorm (norm2)

    q = jnp.dot(xn, wq_ref[...], preferred_element_type=jnp.float32)       # scale pre-folded
    c = jnp.dot(xn, wdkv_ref[...],
                preferred_element_type=jnp.float32).astype(jnp.bfloat16)   # latent compression
    k = jnp.dot(c, wuk_ref[...], preferred_element_type=jnp.float32)
    v = jnp.dot(c, wuv_ref[...], preferred_element_type=jnp.float32)

    q_ref[...] = jnp.transpose(q.reshape(tr, nhead, hd), (1, 0, 2)).astype(q_ref.dtype)
    k_ref[...] = jnp.transpose(k.reshape(tr, nhead, hd), (1, 0, 2)).astype(k_ref.dtype)
    v_ref[...] = jnp.transpose(v.reshape(tr, nhead, hd), (1, 0, 2)).astype(v_ref.dtype)


# ---------------------------------------------------------------------------
# Kernel 2b: head-batched causal flash attention + Wo + residual
# ---------------------------------------------------------------------------
def _mla_attn_kernel(x_ref, q_ref, k_ref, v_ref, wo_ref, o_ref):
    qi = pl.program_id(1)
    nhead, tq, hd = q_ref.shape
    D = nhead * hd

    q3 = q_ref[...]                                                        # (H, tq, hd) bf16
    row = qi * tq + jax.lax.broadcasted_iota(jnp.int32, (nhead, tq, tq), 1)
    col = jax.lax.broadcasted_iota(jnp.int32, (nhead, tq, tq), 2)

    def body(j, carry):
        m, l, acc = carry
        start = pl.multiple_of(j * tq, tq)
        kb = k_ref[:, pl.ds(start, tq), :]                                 # (H, tq, hd)
        vb = v_ref[:, pl.ds(start, tq), :]
        s = jnp.einsum('hqd,hkd->hqk', q3, kb,
                       preferred_element_type=jnp.float32)
        s = jnp.where(j * tq + col <= row, s, -1e30)                        # causal mask
        m_new = jnp.maximum(m, jnp.max(s, axis=-1, keepdims=True))
        alpha = jnp.exp(m - m_new)
        p = jnp.exp(s - m_new)
        l_new = alpha * l + jnp.sum(p, axis=-1, keepdims=True)
        acc_new = alpha * acc + jnp.einsum('hqk,hkd->hqd',
                                           p.astype(jnp.bfloat16), vb,
                                           preferred_element_type=jnp.float32)
        return m_new, l_new, acc_new

    carry0 = (jnp.full((nhead, tq, 1), -jnp.inf, jnp.float32),
              jnp.zeros((nhead, tq, 1), jnp.float32),
              jnp.zeros((nhead, tq, hd), jnp.float32))
    # Causal work skipping: only kv chunks 0..qi are visited.
    m, l, acc = jax.lax.fori_loop(0, qi + 1, body, carry0)

    attn = acc * pl.reciprocal(l, approx=True)                             # (H, tq, hd)
    attn2 = jnp.transpose(attn, (1, 0, 2)).reshape(tq, D).astype(jnp.bfloat16)
    out = jnp.dot(attn2, wo_ref[...], preferred_element_type=jnp.float32)
    o_ref[...] = (x_ref[...].astype(jnp.float32) + out).astype(o_ref.dtype)  # residual


def mla_block(x, prep, *, nhead):
    B, S, D = x.shape
    d_c = prep["wdkv"].shape[1]
    hd = D // nhead
    budget = _vmem_budget_bytes()

    # ---- Pass 1: Q/K/V build (fully parallel; hides the per-batch KV bubble) ----
    w_bytes_1 = 2 * 2 * (D * D + D * d_c + 2 * d_c * D)       # bf16, double-buffered
    cap_tr = max((budget - w_bytes_1) // (20 * D), 8)
    tr = _pick_tile(S, (512, 256, 128, 64, 32, 16, 8), cap=cap_tr)

    q, k, v = pl.pallas_call(
        functools.partial(_mla_qkv_kernel, nhead=nhead),
        out_shape=(
            jax.ShapeDtypeStruct((B, nhead, S, hd), jnp.bfloat16),
            jax.ShapeDtypeStruct((B, nhead, S, hd), jnp.bfloat16),
            jax.ShapeDtypeStruct((B, nhead, S, hd), jnp.bfloat16),
        ),
        grid_spec=pltpu.PrefetchScalarGridSpec(
            num_scalar_prefetch=0,
            grid=(B, S // tr),
            in_specs=[
                pl.BlockSpec((None, tr, D), lambda b, r: (b, r, 0)),
                pl.BlockSpec((1, D), lambda b, r: (0, 0)),
                pl.BlockSpec((D, D), lambda b, r: (0, 0)),        # Wq^T (pre-scaled)
                pl.BlockSpec((D, d_c), lambda b, r: (0, 0)),      # Wdkv^T
                pl.BlockSpec((d_c, D), lambda b, r: (0, 0)),      # Wuk^T
                pl.BlockSpec((d_c, D), lambda b, r: (0, 0)),      # Wuv^T
            ],
            out_specs=(
                pl.BlockSpec((None, nhead, tr, hd), lambda b, r: (b, 0, r, 0)),
                pl.BlockSpec((None, nhead, tr, hd), lambda b, r: (b, 0, r, 0)),
                pl.BlockSpec((None, nhead, tr, hd), lambda b, r: (b, 0, r, 0)),
            ),
        ),
        compiler_params=pltpu.CompilerParams(
            dimension_semantics=("parallel", "parallel"),
            vmem_limit_bytes=budget),
    )(x, prep["norm2_w"], prep["wq"], prep["wdkv"], prep["wuk"], prep["wuv"])

    # ---- Pass 2: causal flash attention over K/V resident per batch element ----
    kv_bytes = 2 * 2 * 2 * S * D                               # K+V bf16, double-buffered
    wo_bytes = 2 * 2 * D * D
    cap_tq = max((budget - kv_bytes - wo_bytes) // (20 * D), 8)
    tq = _pick_tile(S, (256, 128, 64, 32, 16, 8), cap=cap_tq)

    return pl.pallas_call(
        _mla_attn_kernel,
        out_shape=jax.ShapeDtypeStruct((B, S, D), x.dtype),
        grid_spec=pltpu.PrefetchScalarGridSpec(
            num_scalar_prefetch=0,
            grid=(B, S // tq),
            in_specs=[
                pl.BlockSpec((None, tq, D), lambda b, i: (b, i, 0)),          # residual tile
                pl.BlockSpec((None, nhead, tq, hd), lambda b, i: (b, 0, i, 0)),
                pl.BlockSpec((None, nhead, S, hd), lambda b, i: (b, 0, 0, 0)),  # K (per batch)
                pl.BlockSpec((None, nhead, S, hd), lambda b, i: (b, 0, 0, 0)),  # V (per batch)
                pl.BlockSpec((D, D), lambda b, i: (0, 0)),                      # Wo^T
            ],
            out_specs=pl.BlockSpec((None, tq, D), lambda b, i: (b, i, 0)),
        ),
        compiler_params=pltpu.CompilerParams(
            dimension_semantics=("parallel", "parallel"),
            vmem_limit_bytes=budget),
    )(x, q, k, v, prep["wo"])


# ---------------------------------------------------------------------------
# SpatialCubeLayer forward:  x -> FFN residual block -> MLA residual block
# ---------------------------------------------------------------------------
def spatial_cube_layer(x, prep, *, nhead, freqs_cis=None):
    # metrics.start/end are host-side profiling no-ops; dropout = identity (eval).
    # TODO(synk): apply freqs_cis (rotary) once the reference MLA source is available.
    x = ffn_block(x, prep)
    x = mla_block(x, prep, nhead=nhead)
    return x


def init_params(key, d_model, nhead, dim_feedforward, d_c):
    ks = jax.random.split(key, 8)

    def lin(k, fan_in, fan_out):
        bound = 1.0 / math.sqrt(fan_in)
        return jax.random.uniform(k, (fan_in, fan_out), jnp.float32,
                                  minval=-bound, maxval=bound)

    return {
        "norm1_w": jnp.ones((d_model,), jnp.float32),
        "norm2_w": jnp.ones((d_model,), jnp.float32),
        "w1_t": lin(ks[0], d_model, dim_feedforward),
        "w3_t": lin(ks[1], d_model, dim_feedforward),
        "w2_t": lin(ks[2], dim_feedforward, d_model),
        "wq_t": lin(ks[3], d_model, d_model),
        "wdkv_t": lin(ks[4], d_model, d_c),
        "wuk_t": lin(ks[5], d_c, d_model),
        "wuv_t": lin(ks[6], d_c, d_model),
        "wo_t": lin(ks[7], d_model, d_model),
    }


if __name__ == "__main__":
    B, S, D = 2, 8, 32
    NHEAD, FF, D_C = 4, 64, 16          # config.MLA_D_C := 16

    key = jax.random.PRNGKey(0)
    kx, kp = jax.random.split(key)
    x = jax.random.normal(kx, (B, S, D), jnp.float32)
    params = init_params(kp, D, NHEAD, FF, D_C)
    prep = prepare_params(params, d_model=D, nhead=NHEAD, dim_feedforward=FF)

    y = spatial_cube_layer(x, prep, nhead=NHEAD, freqs_cis=None)
    jax.block_until_ready(y)
    assert y.shape == (B, S, D) and not bool(jnp.any(jnp.isnan(y)))
    print("KERNEL_OK")
</pallas_src>

<mosaic_0001>
module attributes {stable_mosaic.version = 11 : i64} {
  func.func @_ffn_kernel_fullf(%arg0: i32, %arg1: memref<16x32xf32, #tpu.memory_space<vmem>>, %arg2: memref<1x32xf32, #tpu.memory_space<vmem>>, %arg3: memref<32x128xbf16, #tpu.memory_space<vmem>>, %arg4: memref<64x32xbf16, #tpu.memory_space<vmem>>, %arg5: memref<16x32xf32, #tpu.memory_space<vmem>>) attributes {dimension_semantics = [#tpu.dimension_semantics<parallel>], iteration_bounds = array<i64: 1>, scalar_prefetch = 0 : i64, scratch_operands = 0 : i64, tpu.core_type = #tpu.core_type<tc>, window_params = [{transform_indices = @transform_0, window_bounds = array<i64: 16, 32>}, {pipeline_mode = #tpu.pipeline_mode<synchronous>, transform_indices = @transform_1, window_bounds = array<i64: 1, 32>}, {pipeline_mode = #tpu.pipeline_mode<synchronous>, transform_indices = @transform_2, window_bounds = array<i64: 32, 128>}, {pipeline_mode = #tpu.pipeline_mode<synchronous>, transform_indices = @transform_3, window_bounds = array<i64: 64, 32>}, {transform_indices = @transform_4, window_bounds = array<i64: 16, 32>}]} {
    %c0 = arith.constant 0 : index
    %c0_0 = arith.constant 0 : index
    %0 = vector.load %arg1[%c0, %c0_0] : memref<16x32xf32, #tpu.memory_space<vmem>>, vector<16x32xf32>
    %1 = arith.mulf %0, %0 : vector<16x32xf32>
    %cst = arith.constant dense<0.000000e+00> : vector<16xf32>
    %2 = vector.multi_reduction <add>, %1, %cst [1] : vector<16x32xf32> to vector<16xf32>
    %3 = vector.shape_cast %2 : vector<16xf32> to vector<16x1xf32>
    %cst_1 = arith.constant 3.200000e+01 : f32
    %4 = vector.broadcast %cst_1 : f32 to vector<16x1xf32>
    %5 = arith.divf %3, %4 : vector<16x1xf32>
    %cst_2 = arith.constant 9.99999997E-7 : f32
    %6 = vector.broadcast %cst_2 : f32 to vector<16x1xf32>
    %7 = arith.addf %5, %6 : vector<16x1xf32>
    %8 = math.rsqrt %7 : vector<16x1xf32>
    %9 = vector.broadcast %8 : vector<16x1xf32> to vector<16x32xf32>
    %10 = arith.mulf %0, %9 : vector<16x32xf32>
    %c0_3 = arith.constant 0 : index
    %c0_4 = arith.constant 0 : index
    %11 = vector.load %arg2[%c0_3, %c0_4] : memref<1x32xf32, #tpu.memory_space<vmem>>, vector<1x32xf32>
    %12 = vector.broadcast %11 : vector<1x32xf32> to vector<16x32xf32>
    %13 = arith.mulf %10, %12 : vector<16x32xf32>
    %14 = arith.truncf %13 : vector<16x32xf32> to vector<16x32xbf16>
    %c0_5 = arith.constant 0 : index
    %c0_6 = arith.constant 0 : index
    %15 = vector.load %arg3[%c0_5, %c0_6] : memref<32x128xbf16, #tpu.memory_space<vmem>>, vector<32x128xbf16>
    %cst_7 = arith.constant dense<0.000000e+00> : vector<16x128xf32>
    %16 = tpu.matmul %14, %15, %cst_7 {dimension_numbers = #tpu.dot_dimension_numbers<[1], [0], [0], [1], [0, 0, 1, 1], [], []>} : vector<16x32xbf16>, vector<32x128xbf16>, vector<16x128xf32> -> vector<16x128xf32>
    %17 = vector.extract_strided_slice %16 {offsets = [0, 0], sizes = [16, 64], strides = [1, 1]} : vector<16x128xf32> to vector<16x64xf32>
    %18 = arith.negf %17 : vector<16x64xf32>
    %19 = math.exp %18 : vector<16x64xf32>
    %cst_8 = arith.constant 1.000000e+00 : f32
    %20 = vector.broadcast %cst_8 : f32 to vector<16x64xf32>
    %21 = arith.addf %20, %19 : vector<16x64xf32>
    %22 = arith.divf %20, %21 : vector<16x64xf32>
    %23 = arith.mulf %17, %22 : vector<16x64xf32>
    %24 = vector.extract_strided_slice %16 {offsets = [0, 64], sizes = [16, 64], strides = [1, 1]} : vector<16x128xf32> to vector<16x64xf32>
    %25 = arith.mulf %23, %24 : vector<16x64xf32>
    %26 = arith.truncf %25 : vector<16x64xf32> to vector<16x64xbf16>
    %c0_9 = arith.constant 0 : index
    %c0_10 = arith.constant 0 : index
    %27 = vector.load %arg4[%c0_9, %c0_10] : memref<64x32xbf16, #tpu.memory_space<vmem>>, vector<64x32xbf16>
    %cst_11 = arith.constant dense<0.000000e+00> : vector<16x32xf32>
    %28 = tpu.matmul %26, %27, %cst_11 {dimension_numbers = #tpu.dot_dimension_numbers<[1], [0], [0], [1], [0, 0, 1, 1], [], []>} : vector<16x64xbf16>, vector<64x32xbf16>, vector<16x32xf32> -> vector<16x32xf32>
    %29 = arith.addf %0, %28 : vector<16x32xf32>
    %c0_12 = arith.constant 0 : index
    %c0_13 = arith.constant 0 : index
    %30 = vector.load %arg5[%c0_12, %c0_13] : memref<16x32xf32, #tpu.memory_space<vmem>>, vector<16x32xf32>
    tpu.vector_store %arg5[%c0_12, %c0_13], %29 {strides = array<i32>} : memref<16x32xf32, #tpu.memory_space<vmem>>, vector<16x32xf32>,
    return
  }
  func.func @transform_0(%arg0: i32) -> (i32, i32) {
    %c0_i32 = arith.constant 0 : i32
    %c0_i32_0 = arith.constant 0 : i32
    return %arg0, %c0_i32 : i32, i32
  }
  func.func @transform_1(%arg0: i32) -> (i32, i32) {
    %c0_i32 = arith.constant 0 : i32
    %c0_i32_0 = arith.constant 0 : i32
    %c0_i32_1 = arith.constant 0 : i32
    return %c0_i32, %c0_i32_0 : i32, i32
  }
  func.func @transform_2(%arg0: i32) -> (i32, i32) {
    %c0_i32 = arith.constant 0 : i32
    %c0_i32_0 = arith.constant 0 : i32
    %c0_i32_1 = arith.constant 0 : i32
    return %c0_i32, %c0_i32_0 : i32, i32
  }
  func.func @transform_3(%arg0: i32) -> (i32, i32) {
    %c0_i32 = arith.constant 0 : i32
    %c0_i32_0 = arith.constant 0 : i32
    %c0_i32_1 = arith.constant 0 : i32
    return %c0_i32, %c0_i32_0 : i32, i32
  }
  func.func @transform_4(%arg0: i32) -> (i32, i32) {
    %c0_i32 = arith.constant 0 : i32
    %c0_i32_0 = arith.constant 0 : i32
    return %arg0, %c0_i32 : i32, i32
  }
}

</mosaic_0001>

<bundles_post_ra>
// kernel: tpu_custom_call.1
= control target key start
LH: loop header
LB: loop body
LE: loop exit
PB: predicated region body
PF: predicated region fallthrough
CT: control target
= control target key end

     0   :  { %9 = vsyncpa [#allocation3], 0  ;;  %s458_s0 = inlined_call_operand.hbm [shape: f32[16,32], index: 0, kind: input, shape index: {}, may-alias: {0,4}]   ;;  %s459_s1 = inlined_call_operand.vmem [shape: f32[1,32], index: 1, kind: input, shape index: {}]   ;;  %s460_s2 = inlined_call_operand.vmem [shape: bf16[32,128], index: 2, kind: input, shape index: {}]   ;;  %s461_s3 = inlined_call_operand.vmem [shape: bf16[64,32], index: 3, kind: input, shape index: {}]   ;;  %s462_s4 = inlined_call_operand.hbm [shape: f32[16,32], index: 4, kind: output, shape index: {}, may-alias: {0,4}]  }
   0x1   :  { %10 = vsyncpa [#allocation4], 0  ;;  %s358_s15 = smov [#allocation2]   ;;  %s310_s19 = scalar_lea.hbm %s458_s0, 256 }
   0x2   :  { %s16_s16 = sshll.u32 %s358_s15, 4  ;;  %p311_p0 = scmp.ne.s32.totalorder %s458_s0, %s310_s19  ;;  %s17_s16 = int_to_ptr.vmem [resolvable:$true] %s16_s16 }
   0x3   :  { %p314_p1 = scmp.lt.u32.totalorder %s310_s19, %s458_s0 }
   0x5   :  { %p316_p2 = pnand %p314_p1, %p311_p0 }
   0x7   :  { %319 = shalt.err (!%p316_p2)
}
   0x8   :  { %s320_s24 = scalar_lea.vmem %s17_s16, 256  ;;  %p325_p4 = scmp.lt.s32.totalorder %s17_s16, %s17_s16 }
   0x9   :  { %p321_p3 = scmp.ne.s32.totalorder %s17_s16, %s320_s24  ;;  %p326_p5 = scmp.lt.s32.totalorder %s320_s24, %s320_s24 }
   0xb   :  { %p327_p6 = por %p326_p5, %p325_p4 }
   0xd   :  { %p328_p7 = pnand %p327_p6, %p321_p3 }
   0xf   :  { %331 = shalt.err (!%p328_p7)
}
  0x10   :  { %s359_s25 = smov 128   ;;  %s360_s26 = smov 8  }
  0x11   :  { %22 = dma.hbm_to_vmem [thread:$0]  %s458_s0, 256, %s17_s16, [#allocation3], %s359_s25, %s359_s25, %s360_s26  }
  0x12   :  { %354 = dma.done.wait [#allocation3], 256  }
  0x13   :  { %355 = vsyncadd [#allocation3], 4294967040  ;;  %v405_v0 = vld [vmem:[#allocation2] sm:$0xff]  ;;  %vm37_vm0 = vcmask 261120   ;;  %v407_v1 = vld [vmem:[#allocation2 + $0x8] sm:$0xff]  ;;  %v361_v7 = vmov 0.0  }
  0x14   :  { %v35_v2 = vmul.f32 %v405_v0, %v405_v0  ;;  %v36_v3 = vmul.f32 %v407_v1, %v407_v1  ;;  %v292_v6 = vld [vmem:[%s460_s2] sm:$0xff]   ;;  %265 = vmatprep.subr.bf16.mxu0 %v361_v7  ;;  %vm362_vm1 = vmmov 0   ;;  %v293_v8 = vld [vmem:[%s460_s2 + $0x8] sm:$0xff]   ;;  %273 = vmatprep.subr.bf16.mxu1 %v361_v7  ;;  %v296_v25 = vld [vmem:[%s461_s3 + $0x10] sm:$0xff]   ;;  %s363_s14 = smov 64   ;;  %vm180_vm2 = vcmask 523264  }
  0x15   :  { %269 = vmatprep.mubr.msk.bf16.mxu0 %vm362_vm1, %v361_v7  ;;  %266 = vmatpush3.bf16.msra.mxu0 %v292_v6  ;;  %v246_v18 = vld [vmem:[%s459_s1] ss:$0 sm:$0xff]  ;;  %v295_v24 = vld [vmem:[%s461_s3 + $0x8] sm:$0xff]   ;;  %v297_v26 = vld [vmem:[%s461_s3 + $0x18] sm:$0xff]  }
  0x16   :  { %v38_v4 = vsel %vm37_vm0, %v35_v2, 0.0  ;;  %v41_v5 = vsel %vm37_vm0, %v36_v3, 0.0  ;;  %267 = vmatprep.subr.bf16.mxu0 %v361_v7  ;;  %281 = vmatprep.mubr.msk.bf16.mxu1 %vm362_vm1, %v361_v7  ;;  %v294_v23 = vld [vmem:[%s461_s3] sm:$0xff]   ;;  %s364_s3 = smov [#allocation5]  }
  0x17   :  { %39 = vadd.xlane.f32.xlu0 %v38_v4  ;;  %274 = vmatpush3.bf16.msra.mxu1 %v294_v23  ;;  %s234_s15 = sshll.u32 %s364_s3, 4  ;;  %s235_s15 = int_to_ptr.vmem [resolvable:$true] %s234_s15 }
  0x18   :  { %275 = vmatprep.subr.bf16.mxu1 %v361_v7  ;;  %s332_s16 = scalar_lea.vmem %s235_s15, 256  ;;  %p337_p9 = scmp.lt.s32.totalorder %s235_s15, %s235_s15 }
  0x19   :  { %268 = vmatpush3.bf16.msra.mxu0 %v293_v8  ;;  %p333_p8 = scmp.ne.s32.totalorder %s235_s15, %s332_s16  ;;  %p338_p10 = scmp.lt.s32.totalorder %s332_s16, %s332_s16 }
  0x1b   :  { %42 = vadd.xlane.f32.xlu0 %v41_v5  ;;  %276 = vmatpush3.bf16.msra.mxu1 %v295_v24  ;;  %p339_p11 = por %p338_p10, %p337_p9 }
  0x1c   :  { %277 = vmatprep.subr.bf16.mxu1 %v361_v7 }
  0x1d   :  { %p340_p12 = pnand %p339_p11, %p333_p8 }
  0x1f   :  { %278 = vmatpush3.bf16.msra.mxu1 %v296_v25 }
  0x20   :  { %279 = vmatprep.subr.bf16.mxu1 %v361_v7 }
  0x23   :  { %280 = vmatpush3.bf16.msra.mxu1 %v297_v26 }
  0xa4   :  { %v40_v9 = vpop.xlane.xlu0 %39 }
  0xa5   :  { %v45_v10 = vmul.f32 0.03125, %v40_v9 }
  0xa7   :  { %v47_v11 = vadd.f32 1e-06, %v45_v10 }
  0xa8   :  { %v43_v12 = vpop.xlane.xlu0 %42 }
  0xa9   :  { %298 = vrsqrt.f32 %v47_v11  ;;  %v46_v13 = vmul.f32 0.03125, %v43_v12 }
  0xab   :  { %v48_v14 = vadd.f32 1e-06, %v46_v13 }
  0xad   :  { %300 = vrsqrt.f32 %v48_v14 }
  0xb3   :  { %v299_v15 = vpop.eup %298 }
  0xb4   :  { %v51_v16 = vmul.f32 %v299_v15, %v405_v0 }
  0xb6   :  { %v60_v20 = vmul.f32 %v246_v18, %v51_v16 }
  0xb7   :  { %v301_v17 = vpop.eup %300 }
  0xb8   :  { %v52_v19 = vmul.f32 %v301_v17, %v407_v1 }
  0xba   :  { %v61_v21 = vmul.f32 %v246_v18, %v52_v19 }
  0xbc   :  { %v62_v22 = vpack.c.bf16 %v61_v21, %v60_v20 }
  0xbe   :  { %270 = vmatmul.mubr.msk.bf16.vlgmr.msra.gmra.mrb[0].mxu0 %vm37_vm0, %v62_v22 }
 0x191   :  { %v116_v27 = vpop.f32.mrb[0].mxu0 }
 0x192   :  { %139 = vrot.lane.b32.xlu1 %v116_v27, %s363_s14  ;;  %v271_v28 = vpop.f32.mrb[1].mxu0  ;;  %v250_v31 = vmul.f32 -1.442695, %v116_v27 }
 0x193   :  { %v119_v29 = vpop.f32.mrb[2].mxu0 }
 0x194   :  { %v272_v30 = vpop.f32.mrb[3].mxu0  ;;  %v251_v32 = vmul.f32 -1.442695, %v119_v29  ;;  %302 = vpow2.f32 %v250_v31 }
 0x196   :  { %141 = vrot.lane.b32.xlu1 %v119_v29, %s363_s14  ;;  %304 = vpow2.f32 %v251_v32 }
 0x19e   :  { %v303_v33 = vpop.eup %302 }
 0x19f   :  { %v129_v35 = vadd.f32 1.0, %v303_v33 }
 0x1a0   :  { %v305_v34 = vpop.eup %304 }
 0x1a1   :  { %v130_v36 = vadd.f32 1.0, %v305_v34  ;;  %306 = vrcp.f32 %v129_v35 }
 0x1a3   :  { %308 = vrcp.f32 %v130_v36 }
 0x1ab   :  { %v307_v37 = vpop.eup %306 }
 0x1ac   :  { %v135_v40 = vmul.f32 %v307_v37, %v116_v27 }
 0x1ad   :  { %v309_v38 = vpop.eup %308 }
 0x1ae   :  { %v136_v41 = vmul.f32 %v309_v38, %v119_v29 }
 0x204   :  { %v140_v39 = vpop.permute.xlu1 %139 }
 0x205   :  { %v145_v43 = vmul.f32 %v140_v39, %v135_v40 }
 0x208   :  { %v142_v42 = vpop.permute.xlu1 %141 }
 0x209   :  { %v146_v44 = vmul.f32 %v142_v42, %v136_v41 }
 0x20b   :  { %v147_v45 = vpack.c.bf16 %v146_v44, %v145_v43 }
 0x20d   :  { %282 = vmatmul.mubr.msk.bf16.vlgmr.msra.gmra.mrb[0].mxu1 %vm180_vm2, %v147_v45 }
 0x2e0   :  { %v218_v46 = vpop.f32.mrb[0].mxu1 }
 0x2e1   :  { %v225_v47 = vadd.f32 %v218_v46, %v405_v0  ;;  %v283_v48 = vpop.f32.mrb[1].mxu1 }
 0x2e2   :  { %v221_v49 = vpop.f32.mrb[2].mxu1 }
 0x2e3   :  { %227 = vst.msk [vmem:[#allocation5] sm:$0xff] %vm37_vm0, %v225_v47  ;;  %v226_v50 = vadd.f32 %v221_v49, %v407_v1  ;;  %v284_v51 = vpop.f32.mrb[3].mxu1 }
 0x2e5   :  { %228 = vst.msk [vmem:[#allocation5 + $0x8] sm:$0xff] %vm37_vm0, %v226_v50 }
 0x2e6   :  { %343 = shalt.err (!%p340_p12)
}
 0x2e7   :  { %s344_s19 = scalar_lea.hbm %s462_s4, 256 }
 0x2e8   :  { %p345_p13 = scmp.ne.s32.totalorder %s462_s4, %s344_s19  ;;  %p348_p0 = scmp.lt.u32.totalorder %s344_s19, %s462_s4 }
 0x2ea   :  { %p350_p1 = pnand %p348_p0, %p345_p13 }
 0x2ec   :  { %353 = shalt.err (!%p350_p1)
}
 0x2ed   :  { %240 = dma.vmem_to_hbm [thread:$0]  %s235_s15, 256, %s462_s4, [#allocation4], %s359_s25, %s359_s25, %s360_s26  }
 0x2ee   :  { %356 = dma.done.wait [#allocation4], 256  }
 0x2ef   :  { %357 = vsyncadd [#allocation4], 4294967040 }
 0x2f0   :  { %244 = vsyncpa [#allocation3], 1 }
 0x2f1   :  { %245 = vsyncpa [#allocation4], 1 }

</bundles_post_ra>
